<compile_context>
chip_gen: v5e
topology: v5e:2x2
jax: 0.10.0
libtpu: 0.0.40
codegen_flags: <defaults>
</compile_context>

<pallas_src>
import math
import functools

import jax
import jax.numpy as jnp
from jax.experimental import pallas as pl
from jax.experimental.pallas import tpu as pltpu


_MAX_ROW_TILE = 512   # rows per grid step for row-parallel matmul kernels
_LANE_PAD = 128       # pad narrow head outputs up to one full lane width


def _row_tile(m):
    """Largest legal row tile: full array if small, else 512 (multiple of 8)."""
    return m if m <= _MAX_ROW_TILE else _MAX_ROW_TILE


# ---------------------------------------------------------------------------
# Kernel 1: fused input_proj (1x1 conv == per-pixel linear) + positional add.
#   out = x @ W + b + pos            x:(tm,C)  W:(C,D) bf16  pos:(tm,D)
# ---------------------------------------------------------------------------
def _input_proj_kernel(x_ref, pos_ref, w_ref, b_ref, o_ref):
    y = jnp.dot(x_ref[...].astype(jnp.bfloat16), w_ref[...],
                preferred_element_type=jnp.float32)
    o_ref[...] = (y + b_ref[...] + pos_ref[...]).astype(o_ref.dtype)


def input_proj_pallas(src_rows, pos_rows, w, b):
    """src_rows: (M, C), pos_rows: (M, D), w: (C, D), b: (D,) -> (M, D) f32."""
    M, C = src_rows.shape
    D = w.shape[1]
    tm = _row_tile(M)
    return pl.pallas_call(
        _input_proj_kernel,
        out_shape=jax.ShapeDtypeStruct((M, D), jnp.float32),
        grid=(pl.cdiv(M, tm),),
        in_specs=[
            pl.BlockSpec((tm, C), lambda i: (i, 0)),
            pl.BlockSpec((tm, D), lambda i: (i, 0)),
            pl.BlockSpec((C, D), lambda i: (0, 0)),
            pl.BlockSpec((1, D), lambda i: (0, 0)),
        ],
        out_specs=pl.BlockSpec((tm, D), lambda i: (i, 0)),
        compiler_params=pltpu.CompilerParams(dimension_semantics=("parallel",)),
    )(src_rows, pos_rows, w.astype(jnp.bfloat16), b.reshape(1, D))


# ---------------------------------------------------------------------------
# Kernel 2: fused L-layer single-head cross-attention decoder stub.
# Grid iterates over batch; memory (K == V) is loaded into VMEM once per batch
# element, cast to bf16 once, and reused across all layers.  All L layer
# outputs are written from the same kernel invocation (static unrolled loop).
# ---------------------------------------------------------------------------
def _make_decoder_kernel(num_layers, scale):
    def kernel(m_ref, qe_ref, hs_ref):
        mem = m_ref[0].astype(jnp.bfloat16)                 # (S, D), resident
        qe = qe_ref[...]                                    # (Q, D) f32
        tgt = jnp.zeros(qe.shape, jnp.float32)
        for layer in range(num_layers):
            q_in = (tgt + qe).astype(jnp.bfloat16)
            # contract last dims: no explicit K transpose is materialized
            s = jax.lax.dot_general(
                q_in, mem, (((1,), (1,)), ((), ())),
                preferred_element_type=jnp.float32) * scale
            s = s - jnp.max(s, axis=-1, keepdims=True)
            p = jnp.exp(s)
            p = p * pl.reciprocal(jnp.sum(p, axis=-1, keepdims=True), approx=True)
            attn = jnp.dot(p.astype(jnp.bfloat16), mem,
                           preferred_element_type=jnp.float32)
            tgt = tgt + attn
            hs_ref[layer, 0] = tgt.astype(hs_ref.dtype)
        # TODO(synk): real DETR transformer (self-attn, FFN, norms, masks) is
        # an injected module not defined in the source; this is a minimal
        # cross-attention stub.  The all-False padding mask is ignored.
    return kernel


def decoder_stub_pallas(memory_tokens, query_embed, num_layers):
    """memory_tokens: (B, S, D), query_embed: (Q, D) -> hs (L, B, Q, D)."""
    B, S, D = memory_tokens.shape
    Q = query_embed.shape[0]
    scale = 1.0 / math.sqrt(D)
    return pl.pallas_call(
        _make_decoder_kernel(num_layers, scale),
        out_shape=jax.ShapeDtypeStruct((num_layers, B, Q, D), jnp.float32),
        grid=(B,),
        in_specs=[
            pl.BlockSpec((1, S, D), lambda b: (b, 0, 0)),
            pl.BlockSpec((Q, D), lambda b: (0, 0)),
        ],
        out_specs=pl.BlockSpec((num_layers, 1, Q, D), lambda b: (0, b, 0, 0)),
        compiler_params=pltpu.CompilerParams(dimension_semantics=("parallel",)),
    )(memory_tokens, query_embed)


# ---------------------------------------------------------------------------
# Kernel 3: fused prediction heads.
#   logits = hs @ Wc + bc                                 (lane-padded to 128)
#   boxes  = sigmoid(relu(relu(hs W0 + b0) W1 + b1) W2 + b2)   (padded to 128)
# hs is read from HBM exactly once; MLP intermediates stay in vregs/VMEM.
# ---------------------------------------------------------------------------
def _heads_kernel(hs_ref, w0_ref, b0_ref, w1_ref, b1_ref,
                  wc_ref, bc_ref, w2_ref, b2_ref, logits_ref, boxes_ref):
    h = hs_ref[...].astype(jnp.bfloat16)                             # (tm, D)
    # class head
    logits = jnp.dot(h, wc_ref[...], preferred_element_type=jnp.float32)
    logits_ref[...] = (logits + bc_ref[...]).astype(logits_ref.dtype)
    # 3-layer bbox MLP
    x = jnp.dot(h, w0_ref[...], preferred_element_type=jnp.float32) + b0_ref[...]
    x = jnp.maximum(x, 0.0).astype(jnp.bfloat16)
    x = jnp.dot(x, w1_ref[...], preferred_element_type=jnp.float32) + b1_ref[...]
    x = jnp.maximum(x, 0.0).astype(jnp.bfloat16)
    z = jnp.dot(x, w2_ref[...], preferred_element_type=jnp.float32) + b2_ref[...]
    boxes_ref[...] = jax.nn.sigmoid(z).astype(boxes_ref.dtype)


def heads_pallas(hs_flat, params):
    """hs_flat: (M, D) -> (logits_padded (M,128), boxes_padded (M,128)) f32."""
    M, D = hs_flat.shape
    Nc = params["class_w"].shape[1]
    assert Nc <= _LANE_PAD and 4 <= _LANE_PAD
    # pad output-producing weights/biases to a full 128-lane slab (unmasked vst)
    wc = jnp.pad(params["class_w"], ((0, 0), (0, _LANE_PAD - Nc))).astype(jnp.bfloat16)
    bc = jnp.pad(params["class_b"], (0, _LANE_PAD - Nc)).reshape(1, _LANE_PAD)
    w2 = jnp.pad(params["bbox_w2"], ((0, 0), (0, _LANE_PAD - 4))).astype(jnp.bfloat16)
    b2 = jnp.pad(params["bbox_b2"], (0, _LANE_PAD - 4)).reshape(1, _LANE_PAD)
    w0 = params["bbox_w0"].astype(jnp.bfloat16)
    w1 = params["bbox_w1"].astype(jnp.bfloat16)
    b0 = params["bbox_b0"].reshape(1, D)
    b1 = params["bbox_b1"].reshape(1, D)

    tm = _row_tile(M)
    full = lambda i: (0, 0)
    rows = lambda i: (i, 0)
    logits_p, boxes_p = pl.pallas_call(
        _heads_kernel,
        out_shape=(jax.ShapeDtypeStruct((M, _LANE_PAD), jnp.float32),
                   jax.ShapeDtypeStruct((M, _LANE_PAD), jnp.float32)),
        grid=(pl.cdiv(M, tm),),
        in_specs=[
            pl.BlockSpec((tm, D), rows),
            pl.BlockSpec((D, D), full), pl.BlockSpec((1, D), full),
            pl.BlockSpec((D, D), full), pl.BlockSpec((1, D), full),
            pl.BlockSpec((D, _LANE_PAD), full), pl.BlockSpec((1, _LANE_PAD), full),
            pl.BlockSpec((D, _LANE_PAD), full), pl.BlockSpec((1, _LANE_PAD), full),
        ],
        out_specs=(pl.BlockSpec((tm, _LANE_PAD), rows),
                   pl.BlockSpec((tm, _LANE_PAD), rows)),
        compiler_params=pltpu.CompilerParams(dimension_semantics=("parallel",)),
    )(hs_flat, w0, b0, w1, b1, wc, bc, w2, b2)
    return logits_p, boxes_p


# ---------------------------------------------------------------------------
# Parameter construction (deterministic, mirrors DETR.__init__ shapes).
# ---------------------------------------------------------------------------
def init_detr_params(key, backbone_channels, hidden_dim, num_classes, num_queries):
    ks = jax.random.split(key, 12)
    p = {}
    # input_proj: Conv2d(C, D, kernel_size=1) -> weight stored as (C, D), bias (D,)
    p["input_proj_w"] = 0.02 * jax.random.normal(ks[0], (backbone_channels, hidden_dim), jnp.float32)
    p["input_proj_b"] = 0.01 * jax.random.normal(ks[1], (hidden_dim,), jnp.float32)
    # query_embed: Embedding(num_queries, D)
    p["query_embed"] = 0.02 * jax.random.normal(ks[2], (num_queries, hidden_dim), jnp.float32)
    # class_embed: Linear(D, num_classes + 1)
    p["class_w"] = 0.02 * jax.random.normal(ks[3], (hidden_dim, num_classes + 1), jnp.float32)
    p["class_b"] = 0.01 * jax.random.normal(ks[4], (num_classes + 1,), jnp.float32)
    # bbox_embed: MLP(D, D, 4, num_layers=3)
    p["bbox_w0"] = 0.02 * jax.random.normal(ks[5], (hidden_dim, hidden_dim), jnp.float32)
    p["bbox_b0"] = 0.01 * jax.random.normal(ks[6], (hidden_dim,), jnp.float32)
    p["bbox_w1"] = 0.02 * jax.random.normal(ks[7], (hidden_dim, hidden_dim), jnp.float32)
    p["bbox_b1"] = 0.01 * jax.random.normal(ks[8], (hidden_dim,), jnp.float32)
    p["bbox_w2"] = 0.02 * jax.random.normal(ks[9], (hidden_dim, 4), jnp.float32)
    p["bbox_b2"] = 0.01 * jax.random.normal(ks[10], (4,), jnp.float32)
    return p


# ---------------------------------------------------------------------------
# DETR forward.
# ---------------------------------------------------------------------------
def detr_forward(params, src, mask, pos, num_decoder_layers=3):
    """
    src : (B, C, H, W)   backbone feature map (NCHW, like PyTorch)
    mask: (B, H, W)      padding mask (bool) -- all-False here
    pos : (B, D, H, W)   positional encoding (NCHW)
    Returns (out_dict, targets, features, memory, hs) mirroring DETR.forward.
    """
    B, C, H, W = src.shape
    D = params["input_proj_w"].shape[1]
    Q = params["query_embed"].shape[0]
    L = num_decoder_layers
    num_cls_p1 = params["class_w"].shape[1]

    # ---- input_proj (1x1 conv) fused with positional-encoding add ----
    src_rows = jnp.transpose(src, (0, 2, 3, 1)).reshape(B * H * W, C)   # NCHW -> rows
    pos_rows = jnp.transpose(pos, (0, 2, 3, 1)).reshape(B * H * W, D)
    memory_rows = input_proj_pallas(src_rows, pos_rows,
                                    params["input_proj_w"], params["input_proj_b"])
    memory_tokens = memory_rows.reshape(B, H * W, D)                    # (B, S, D)

    # ---- transformer decoder stub (all L layers fused, K==V resident) ----
    hs = decoder_stub_pallas(memory_tokens, params["query_embed"], L)   # (L, B, Q, D)
    hs_without_norm = hs
    memory = jnp.transpose(memory_tokens, (0, 2, 1)).reshape(B, D, H, W)

    # ---- fused prediction heads (class + bbox MLP, lane-dense outputs) ----
    hs_flat = hs.reshape(L * B * Q, D)
    logits_p, boxes_p = heads_pallas(hs_flat, params)
    outputs_class = logits_p[:, :num_cls_p1].reshape(L, B, Q, num_cls_p1)
    outputs_coord = boxes_p[:, :4].reshape(L, B, Q, 4)

    out = {
        "pred_logits": outputs_class[-1],        # (B, Q, num_classes+1)
        "pred_boxes": outputs_coord[-1],         # (B, Q, 4), in (0,1) via sigmoid
        "hs_embed": hs_without_norm[-1],         # (B, Q, D)
    }
    features = src
    targets = None
    return out, targets, features, memory, hs


if __name__ == "__main__":
    # Small, DETR-consistent shapes.
    B, C, H, W = 2, 8, 8, 8          # batch, backbone channels, feature-map spatial
    D = 32                           # hidden_dim (transformer.d_model)
    NUM_QUERIES = 8
    NUM_CLASSES = 5
    L = 3                            # decoder layers

    key = jax.random.PRNGKey(0)
    k_param, k_src, k_pos = jax.random.split(key, 3)

    params = init_detr_params(k_param, C, D, NUM_CLASSES, NUM_QUERIES)

    # TODO(synk): backbone is an injected module (e.g. ResNet) not defined in the
    # source; deterministic synthetic feature map / positional encoding used.
    src = jax.random.normal(k_src, (B, C, H, W), jnp.float32)
    pos = 0.1 * jax.random.normal(k_pos, (B, D, H, W), jnp.float32)
    mask = jnp.zeros((B, H, W), jnp.bool_)

    fwd = jax.jit(functools.partial(detr_forward, num_decoder_layers=L))
    out, targets, features, memory, hs = fwd(params, src, mask, pos)
    jax.block_until_ready((out, memory, hs))

    assert out["pred_logits"].shape == (B, NUM_QUERIES, NUM_CLASSES + 1)
    assert out["pred_boxes"].shape == (B, NUM_QUERIES, 4)
    assert out["hs_embed"].shape == (B, NUM_QUERIES, D)
    assert memory.shape == (B, D, H, W)
    assert hs.shape == (L, B, NUM_QUERIES, D)
    assert bool(jnp.all((out["pred_boxes"] >= 0.0) & (out["pred_boxes"] <= 1.0)))
    assert bool(jnp.all(jnp.isfinite(out["pred_logits"])))

    print("KERNEL_OK")
</pallas_src>

<mosaic_0001>
module attributes {stable_mosaic.version = 11 : i64} {
  func.func @kernel(%arg0: i32, %arg1: memref<1x64x32xf32, #tpu.memory_space<vmem>>, %arg2: memref<8x32xf32, #tpu.memory_space<vmem>>, %arg3: memref<3x1x8x32xf32, #tpu.memory_space<vmem>>) attributes {dimension_semantics = [#tpu.dimension_semantics<parallel>], iteration_bounds = array<i64: 2>, scalar_prefetch = 0 : i64, scratch_operands = 0 : i64, tpu.core_type = #tpu.core_type<tc>, window_params = [{transform_indices = @transform_0, window_bounds = array<i64: 1, 64, 32>}, {pipeline_mode = #tpu.pipeline_mode<synchronous>, transform_indices = @transform_1, window_bounds = array<i64: 8, 32>}, {transform_indices = @transform_2, window_bounds = array<i64: 3, 1, 8, 32>}]} {
    %c0 = arith.constant 0 : index
    %c0_0 = arith.constant 0 : index
    %c0_1 = arith.constant 0 : index
    %0 = vector.load %arg1[%c0, %c0_0, %c0_1] : memref<1x64x32xf32, #tpu.memory_space<vmem>>, vector<1x64x32xf32>
    %1 = vector.shape_cast %0 : vector<1x64x32xf32> to vector<64x32xf32>
    %2 = arith.truncf %1 : vector<64x32xf32> to vector<64x32xbf16>
    %c0_2 = arith.constant 0 : index
    %c0_3 = arith.constant 0 : index
    %3 = vector.load %arg2[%c0_2, %c0_3] : memref<8x32xf32, #tpu.memory_space<vmem>>, vector<8x32xf32>
    %cst = arith.constant 0.000000e+00 : f32
    %4 = vector.broadcast %cst : f32 to vector<8x32xf32>
    %5 = arith.addf %4, %3 : vector<8x32xf32>
    %6 = arith.truncf %5 : vector<8x32xf32> to vector<8x32xbf16>
    %cst_4 = arith.constant dense<0.000000e+00> : vector<8x64xf32>
    %7 = tpu.matmul %6, %2, %cst_4 {dimension_numbers = #tpu.dot_dimension_numbers<[1], [1], [0], [0], [0, 0, 1, 0], [], []>} : vector<8x32xbf16>, vector<64x32xbf16>, vector<8x64xf32> -> vector<8x64xf32>
    %cst_5 = arith.constant 0.176776692 : f32
    %8 = vector.broadcast %cst_5 : f32 to vector<8x64xf32>
    %9 = arith.mulf %7, %8 : vector<8x64xf32>
    %cst_6 = arith.constant dense<0xFF800000> : vector<8xf32>
    %10 = vector.multi_reduction <maximumf>, %9, %cst_6 [1] : vector<8x64xf32> to vector<8xf32>
    %11 = vector.shape_cast %10 : vector<8xf32> to vector<8x1xf32>
    %12 = vector.broadcast %11 : vector<8x1xf32> to vector<8x64xf32>
    %13 = arith.subf %9, %12 : vector<8x64xf32>
    %14 = math.exp %13 : vector<8x64xf32>
    %cst_7 = arith.constant dense<0.000000e+00> : vector<8xf32>
    %15 = vector.multi_reduction <add>, %14, %cst_7 [1] : vector<8x64xf32> to vector<8xf32>
    %16 = vector.shape_cast %15 : vector<8xf32> to vector<8x1xf32>
    %17 = tpu.reciprocal %16 {approx = true} : vector<8x1xf32> -> vector<8x1xf32>
    %18 = vector.broadcast %17 : vector<8x1xf32> to vector<8x64xf32>
    %19 = arith.mulf %14, %18 : vector<8x64xf32>
    %20 = arith.truncf %19 : vector<8x64xf32> to vector<8x64xbf16>
    %cst_8 = arith.constant dense<0.000000e+00> : vector<8x32xf32>
    %21 = tpu.matmul %20, %2, %cst_8 {dimension_numbers = #tpu.dot_dimension_numbers<[1], [0], [0], [1], [0, 0, 1, 1], [], []>} : vector<8x64xbf16>, vector<64x32xbf16>, vector<8x32xf32> -> vector<8x32xf32>
    %22 = arith.addf %4, %21 : vector<8x32xf32>
    %c0_9 = arith.constant 0 : index
    %c0_10 = arith.constant 0 : index
    %c0_11 = arith.constant 0 : index
    %c0_12 = arith.constant 0 : index
    %23 = vector.load %arg3[%c0_9, %c0_10, %c0_11, %c0_12] : memref<3x1x8x32xf32, #tpu.memory_space<vmem>>, vector<1x1x8x32xf32>
    %24 = vector.shape_cast %23 : vector<1x1x8x32xf32> to vector<8x32xf32>
    %25 = vector.shape_cast %22 : vector<8x32xf32> to vector<1x1x8x32xf32>
    tpu.vector_store %arg3[%c0_9, %c0_10, %c0_11, %c0_12], %25 {strides = array<i32>} : memref<3x1x8x32xf32, #tpu.memory_space<vmem>>, vector<1x1x8x32xf32>,
    %26 = arith.addf %22, %3 : vector<8x32xf32>
    %27 = arith.truncf %26 : vector<8x32xf32> to vector<8x32xbf16>
    %cst_13 = arith.constant dense<0.000000e+00> : vector<8x64xf32>
    %28 = tpu.matmul %27, %2, %cst_13 {dimension_numbers = #tpu.dot_dimension_numbers<[1], [1], [0], [0], [0, 0, 1, 0], [], []>} : vector<8x32xbf16>, vector<64x32xbf16>, vector<8x64xf32> -> vector<8x64xf32>
    %cst_14 = arith.constant 0.176776692 : f32
    %29 = vector.broadcast %cst_14 : f32 to vector<8x64xf32>
    %30 = arith.mulf %28, %29 : vector<8x64xf32>
    %cst_15 = arith.constant dense<0xFF800000> : vector<8xf32>
    %31 = vector.multi_reduction <maximumf>, %30, %cst_15 [1] : vector<8x64xf32> to vector<8xf32>
    %32 = vector.shape_cast %31 : vector<8xf32> to vector<8x1xf32>
    %33 = vector.broadcast %32 : vector<8x1xf32> to vector<8x64xf32>
    %34 = arith.subf %30, %33 : vector<8x64xf32>
    %35 = math.exp %34 : vector<8x64xf32>
    %cst_16 = arith.constant dense<0.000000e+00> : vector<8xf32>
    %36 = vector.multi_reduction <add>, %35, %cst_16 [1] : vector<8x64xf32> to vector<8xf32>
    %37 = vector.shape_cast %36 : vector<8xf32> to vector<8x1xf32>
    %38 = tpu.reciprocal %37 {approx = true} : vector<8x1xf32> -> vector<8x1xf32>
    %39 = vector.broadcast %38 : vector<8x1xf32> to vector<8x64xf32>
    %40 = arith.mulf %35, %39 : vector<8x64xf32>
    %41 = arith.truncf %40 : vector<8x64xf32> to vector<8x64xbf16>
    %cst_17 = arith.constant dense<0.000000e+00> : vector<8x32xf32>
    %42 = tpu.matmul %41, %2, %cst_17 {dimension_numbers = #tpu.dot_dimension_numbers<[1], [0], [0], [1], [0, 0, 1, 1], [], []>} : vector<8x64xbf16>, vector<64x32xbf16>, vector<8x32xf32> -> vector<8x32xf32>
    %43 = arith.addf %22, %42 : vector<8x32xf32>
    %c1 = arith.constant 1 : index
    %c0_18 = arith.constant 0 : index
    %c0_19 = arith.constant 0 : index
    %c0_20 = arith.constant 0 : index
    %44 = vector.load %arg3[%c1, %c0_18, %c0_19, %c0_20] : memref<3x1x8x32xf32, #tpu.memory_space<vmem>>, vector<1x1x8x32xf32>
    %45 = vector.shape_cast %44 : vector<1x1x8x32xf32> to vector<8x32xf32>
    %46 = vector.shape_cast %43 : vector<8x32xf32> to vector<1x1x8x32xf32>
    tpu.vector_store %arg3[%c1, %c0_18, %c0_19, %c0_20], %46 {strides = array<i32>} : memref<3x1x8x32xf32, #tpu.memory_space<vmem>>, vector<1x1x8x32xf32>,
    %47 = arith.addf %43, %3 : vector<8x32xf32>
    %48 = arith.truncf %47 : vector<8x32xf32> to vector<8x32xbf16>
    %cst_21 = arith.constant dense<0.000000e+00> : vector<8x64xf32>
    %49 = tpu.matmul %48, %2, %cst_21 {dimension_numbers = #tpu.dot_dimension_numbers<[1], [1], [0], [0], [0, 0, 1, 0], [], []>} : vector<8x32xbf16>, vector<64x32xbf16>, vector<8x64xf32> -> vector<8x64xf32>
    %cst_22 = arith.constant 0.176776692 : f32
    %50 = vector.broadcast %cst_22 : f32 to vector<8x64xf32>
    %51 = arith.mulf %49, %50 : vector<8x64xf32>
    %cst_23 = arith.constant dense<0xFF800000> : vector<8xf32>
    %52 = vector.multi_reduction <maximumf>, %51, %cst_23 [1] : vector<8x64xf32> to vector<8xf32>
    %53 = vector.shape_cast %52 : vector<8xf32> to vector<8x1xf32>
    %54 = vector.broadcast %53 : vector<8x1xf32> to vector<8x64xf32>
    %55 = arith.subf %51, %54 : vector<8x64xf32>
    %56 = math.exp %55 : vector<8x64xf32>
    %cst_24 = arith.constant dense<0.000000e+00> : vector<8xf32>
    %57 = vector.multi_reduction <add>, %56, %cst_24 [1] : vector<8x64xf32> to vector<8xf32>
    %58 = vector.shape_cast %57 : vector<8xf32> to vector<8x1xf32>
    %59 = tpu.reciprocal %58 {approx = true} : vector<8x1xf32> -> vector<8x1xf32>
    %60 = vector.broadcast %59 : vector<8x1xf32> to vector<8x64xf32>
    %61 = arith.mulf %56, %60 : vector<8x64xf32>
    %62 = arith.truncf %61 : vector<8x64xf32> to vector<8x64xbf16>
    %cst_25 = arith.constant dense<0.000000e+00> : vector<8x32xf32>
    %63 = tpu.matmul %62, %2, %cst_25 {dimension_numbers = #tpu.dot_dimension_numbers<[1], [0], [0], [1], [0, 0, 1, 1], [], []>} : vector<8x64xbf16>, vector<64x32xbf16>, vector<8x32xf32> -> vector<8x32xf32>
    %64 = arith.addf %43, %63 : vector<8x32xf32>
    %c2 = arith.constant 2 : index
    %c0_26 = arith.constant 0 : index
    %c0_27 = arith.constant 0 : index
    %c0_28 = arith.constant 0 : index
    %65 = vector.load %arg3[%c2, %c0_26, %c0_27, %c0_28] : memref<3x1x8x32xf32, #tpu.memory_space<vmem>>, vector<1x1x8x32xf32>
    %66 = vector.shape_cast %65 : vector<1x1x8x32xf32> to vector<8x32xf32>
    %67 = vector.shape_cast %64 : vector<8x32xf32> to vector<1x1x8x32xf32>
    tpu.vector_store %arg3[%c2, %c0_26, %c0_27, %c0_28], %67 {strides = array<i32>} : memref<3x1x8x32xf32, #tpu.memory_space<vmem>>, vector<1x1x8x32xf32>,
    return
  }
  func.func @transform_0(%arg0: i32) -> (i32, i32, i32) {
    %c0_i32 = arith.constant 0 : i32
    %c0_i32_0 = arith.constant 0 : i32
    %c0_i32_1 = arith.constant 0 : i32
    return %arg0, %c0_i32, %c0_i32_0 : i32, i32, i32
  }
  func.func @transform_1(%arg0: i32) -> (i32, i32) {
    %c0_i32 = arith.constant 0 : i32
    %c0_i32_0 = arith.constant 0 : i32
    %c0_i32_1 = arith.constant 0 : i32
    return %c0_i32, %c0_i32_0 : i32, i32
  }
  func.func @transform_2(%arg0: i32) -> (i32, i32, i32, i32) {
    %c0_i32 = arith.constant 0 : i32
    %c0_i32_0 = arith.constant 0 : i32
    %c0_i32_1 = arith.constant 0 : i32
    %c0_i32_2 = arith.constant 0 : i32
    return %c0_i32, %arg0, %c0_i32_0, %c0_i32_1 : i32, i32, i32, i32
  }
}

module attributes {stable_mosaic.version = 11 : i64} {
  func.func @_input_proj_kernel(%arg0: i32, %arg1: memref<128x8xf32, #tpu.memory_space<vmem>>, %arg2: memref<128x32xf32, #tpu.memory_space<vmem>>, %arg3: memref<8x32xbf16, #tpu.memory_space<vmem>>, %arg4: memref<1x32xf32, #tpu.memory_space<vmem>>, %arg5: memref<128x32xf32, #tpu.memory_space<vmem>>) attributes {dimension_semantics = [#tpu.dimension_semantics<parallel>], iteration_bounds = array<i64: 1>, scalar_prefetch = 0 : i64, scratch_operands = 0 : i64, tpu.core_type = #tpu.core_type<tc>, window_params = [{transform_indices = @transform_0, window_bounds = array<i64: 128, 8>}, {transform_indices = @transform_1, window_bounds = array<i64: 128, 32>}, {pipeline_mode = #tpu.pipeline_mode<synchronous>, transform_indices = @transform_2, window_bounds = array<i64: 8, 32>}, {pipeline_mode = #tpu.pipeline_mode<synchronous>, transform_indices = @transform_3, window_bounds = array<i64: 1, 32>}, {transform_indices = @transform_4, window_bounds = array<i64: 128, 32>}]} {
    %c0 = arith.constant 0 : index
    %c0_0 = arith.constant 0 : index
    %0 = vector.load %arg1[%c0, %c0_0] : memref<128x8xf32, #tpu.memory_space<vmem>>, vector<128x8xf32>
    %1 = arith.truncf %0 : vector<128x8xf32> to vector<128x8xbf16>
    %c0_1 = arith.constant 0 : index
    %c0_2 = arith.constant 0 : index
    %2 = vector.load %arg3[%c0_1, %c0_2] : memref<8x32xbf16, #tpu.memory_space<vmem>>, vector<8x32xbf16>
    %cst = arith.constant dense<0.000000e+00> : vector<128x32xf32>
    %3 = tpu.matmul %1, %2, %cst {dimension_numbers = #tpu.dot_dimension_numbers<[1], [0], [0], [1], [0, 0, 1, 1], [], []>} : vector<128x8xbf16>, vector<8x32xbf16>, vector<128x32xf32> -> vector<128x32xf32>
    %c0_3 = arith.constant 0 : index
    %c0_4 = arith.constant 0 : index
    %4 = vector.load %arg4[%c0_3, %c0_4] : memref<1x32xf32, #tpu.memory_space<vmem>>, vector<1x32xf32>
    %5 = vector.broadcast %4 : vector<1x32xf32> to vector<128x32xf32>
    %6 = arith.addf %3, %5 : vector<128x32xf32>
    %c0_5 = arith.constant 0 : index
    %c0_6 = arith.constant 0 : index
    %7 = vector.load %arg2[%c0_5, %c0_6] : memref<128x32xf32, #tpu.memory_space<vmem>>, vector<128x32xf32>
    %8 = arith.addf %6, %7 : vector<128x32xf32>
    %c0_7 = arith.constant 0 : index
    %c0_8 = arith.constant 0 : index
    %9 = vector.load %arg5[%c0_7, %c0_8] : memref<128x32xf32, #tpu.memory_space<vmem>>, vector<128x32xf32>
    tpu.vector_store %arg5[%c0_7, %c0_8], %8 {strides = array<i32>} : memref<128x32xf32, #tpu.memory_space<vmem>>, vector<128x32xf32>,
    return
  }
  func.func @transform_0(%arg0: i32) -> (i32, i32) {
    %c0_i32 = arith.constant 0 : i32
    %c0_i32_0 = arith.constant 0 : i32
    return %arg0, %c0_i32 : i32, i32
  }
  func.func @transform_1(%arg0: i32) -> (i32, i32) {
    %c0_i32 = arith.constant 0 : i32
    %c0_i32_0 = arith.constant 0 : i32
    return %arg0, %c0_i32 : i32, i32
  }
  func.func @transform_2(%arg0: i32) -> (i32, i32) {
    %c0_i32 = arith.constant 0 : i32
    %c0_i32_0 = arith.constant 0 : i32
    %c0_i32_1 = arith.constant 0 : i32
    return %c0_i32, %c0_i32_0 : i32, i32
  }
  func.func @transform_3(%arg0: i32) -> (i32, i32) {
    %c0_i32 = arith.constant 0 : i32
    %c0_i32_0 = arith.constant 0 : i32
    %c0_i32_1 = arith.constant 0 : i32
    return %c0_i32, %c0_i32_0 : i32, i32
  }
  func.func @transform_4(%arg0: i32) -> (i32, i32) {
    %c0_i32 = arith.constant 0 : i32
    %c0_i32_0 = arith.constant 0 : i32
    return %arg0, %c0_i32 : i32, i32
  }
}

module attributes {stable_mosaic.version = 11 : i64} {
  func.func @_heads_kernel(%arg0: i32, %arg1: memref<48x32xf32, #tpu.memory_space<vmem>>, %arg2: memref<32x32xbf16, #tpu.memory_space<vmem>>, %arg3: memref<1x32xf32, #tpu.memory_space<vmem>>, %arg4: memref<32x32xbf16, #tpu.memory_space<vmem>>, %arg5: memref<1x32xf32, #tpu.memory_space<vmem>>, %arg6: memref<32x128xbf16, #tpu.memory_space<vmem>>, %arg7: memref<1x128xf32, #tpu.memory_space<vmem>>, %arg8: memref<32x128xbf16, #tpu.memory_space<vmem>>, %arg9: memref<1x128xf32, #tpu.memory_space<vmem>>, %arg10: memref<48x128xf32, #tpu.memory_space<vmem>>, %arg11: memref<48x128xf32, #tpu.memory_space<vmem>>) attributes {dimension_semantics = [#tpu.dimension_semantics<parallel>], iteration_bounds = array<i64: 1>, scalar_prefetch = 0 : i64, scratch_operands = 0 : i64, tpu.core_type = #tpu.core_type<tc>, window_params = [{transform_indices = @transform_0, window_bounds = array<i64: 48, 32>}, {pipeline_mode = #tpu.pipeline_mode<synchronous>, transform_indices = @transform_1, window_bounds = array<i64: 32, 32>}, {pipeline_mode = #tpu.pipeline_mode<synchronous>, transform_indices = @transform_2, window_bounds = array<i64: 1, 32>}, {pipeline_mode = #tpu.pipeline_mode<synchronous>, transform_indices = @transform_3, window_bounds = array<i64: 32, 32>}, {pipeline_mode = #tpu.pipeline_mode<synchronous>, transform_indices = @transform_4, window_bounds = array<i64: 1, 32>}, {pipeline_mode = #tpu.pipeline_mode<synchronous>, transform_indices = @transform_5, window_bounds = array<i64: 32, 128>}, {pipeline_mode = #tpu.pipeline_mode<synchronous>, transform_indices = @transform_6, window_bounds = array<i64: 1, 128>}, {pipeline_mode = #tpu.pipeline_mode<synchronous>, transform_indices = @transform_7, window_bounds = array<i64: 32, 128>}, {pipeline_mode = #tpu.pipeline_mode<synchronous>, transform_indices = @transform_8, window_bounds = array<i64: 1, 128>}, {transform_indices = @transform_9, window_bounds = array<i64: 48, 128>}, {transform_indices = @transform_10, window_bounds = array<i64: 48, 128>}]} {
    %c0 = arith.constant 0 : index
    %c0_0 = arith.constant 0 : index
    %0 = vector.load %arg1[%c0, %c0_0] : memref<48x32xf32, #tpu.memory_space<vmem>>, vector<48x32xf32>
    %1 = arith.truncf %0 : vector<48x32xf32> to vector<48x32xbf16>
    %c0_1 = arith.constant 0 : index
    %c0_2 = arith.constant 0 : index
    %2 = vector.load %arg6[%c0_1, %c0_2] : memref<32x128xbf16, #tpu.memory_space<vmem>>, vector<32x128xbf16>
    %cst = arith.constant dense<0.000000e+00> : vector<48x128xf32>
    %3 = tpu.matmul %1, %2, %cst {dimension_numbers = #tpu.dot_dimension_numbers<[1], [0], [0], [1], [0, 0, 1, 1], [], []>} : vector<48x32xbf16>, vector<32x128xbf16>, vector<48x128xf32> -> vector<48x128xf32>
    %c0_3 = arith.constant 0 : index
    %c0_4 = arith.constant 0 : index
    %4 = vector.load %arg7[%c0_3, %c0_4] : memref<1x128xf32, #tpu.memory_space<vmem>>, vector<1x128xf32>
    %5 = vector.broadcast %4 : vector<1x128xf32> to vector<48x128xf32>
    %6 = arith.addf %3, %5 : vector<48x128xf32>
    %c0_5 = arith.constant 0 : index
    %c0_6 = arith.constant 0 : index
    %7 = vector.load %arg10[%c0_5, %c0_6] : memref<48x128xf32, #tpu.memory_space<vmem>>, vector<48x128xf32>
    tpu.vector_store %arg10[%c0_5, %c0_6], %6 {strides = array<i32>} : memref<48x128xf32, #tpu.memory_space<vmem>>, vector<48x128xf32>,
    %c0_7 = arith.constant 0 : index
    %c0_8 = arith.constant 0 : index
    %8 = vector.load %arg2[%c0_7, %c0_8] : memref<32x32xbf16, #tpu.memory_space<vmem>>, vector<32x32xbf16>
    %cst_9 = arith.constant dense<0.000000e+00> : vector<48x32xf32>
    %9 = tpu.matmul %1, %8, %cst_9 {dimension_numbers = #tpu.dot_dimension_numbers<[1], [0], [0], [1], [0, 0, 1, 1], [], []>} : vector<48x32xbf16>, vector<32x32xbf16>, vector<48x32xf32> -> vector<48x32xf32>
    %c0_10 = arith.constant 0 : index
    %c0_11 = arith.constant 0 : index
    %10 = vector.load %arg3[%c0_10, %c0_11] : memref<1x32xf32, #tpu.memory_space<vmem>>, vector<1x32xf32>
    %11 = vector.broadcast %10 : vector<1x32xf32> to vector<48x32xf32>
    %12 = arith.addf %9, %11 : vector<48x32xf32>
    %cst_12 = arith.constant 0.000000e+00 : f32
    %13 = vector.broadcast %cst_12 : f32 to vector<48x32xf32>
    %14 = arith.maximumf %12, %13 : vector<48x32xf32>
    %15 = arith.truncf %14 : vector<48x32xf32> to vector<48x32xbf16>
    %c0_13 = arith.constant 0 : index
    %c0_14 = arith.constant 0 : index
    %16 = vector.load %arg4[%c0_13, %c0_14] : memref<32x32xbf16, #tpu.memory_space<vmem>>, vector<32x32xbf16>
    %cst_15 = arith.constant dense<0.000000e+00> : vector<48x32xf32>
    %17 = tpu.matmul %15, %16, %cst_15 {dimension_numbers = #tpu.dot_dimension_numbers<[1], [0], [0], [1], [0, 0, 1, 1], [], []>} : vector<48x32xbf16>, vector<32x32xbf16>, vector<48x32xf32> -> vector<48x32xf32>
    %c0_16 = arith.constant 0 : index
    %c0_17 = arith.constant 0 : index
    %18 = vector.load %arg5[%c0_16, %c0_17] : memref<1x32xf32, #tpu.memory_space<vmem>>, vector<1x32xf32>
    %19 = vector.broadcast %18 : vector<1x32xf32> to vector<48x32xf32>
    %20 = arith.addf %17, %19 : vector<48x32xf32>
    %cst_18 = arith.constant 0.000000e+00 : f32
    %21 = vector.broadcast %cst_18 : f32 to vector<48x32xf32>
    %22 = arith.maximumf %20, %21 : vector<48x32xf32>
    %23 = arith.truncf %22 : vector<48x32xf32> to vector<48x32xbf16>
    %c0_19 = arith.constant 0 : index
    %c0_20 = arith.constant 0 : index
    %24 = vector.load %arg8[%c0_19, %c0_20] : memref<32x128xbf16, #tpu.memory_space<vmem>>, vector<32x128xbf16>
    %cst_21 = arith.constant dense<0.000000e+00> : vector<48x128xf32>
    %25 = tpu.matmul %23, %24, %cst_21 {dimension_numbers = #tpu.dot_dimension_numbers<[1], [0], [0], [1], [0, 0, 1, 1], [], []>} : vector<48x32xbf16>, vector<32x128xbf16>, vector<48x128xf32> -> vector<48x128xf32>
    %c0_22 = arith.constant 0 : index
    %c0_23 = arith.constant 0 : index
    %26 = vector.load %arg9[%c0_22, %c0_23] : memref<1x128xf32, #tpu.memory_space<vmem>>, vector<1x128xf32>
    %27 = vector.broadcast %26 : vector<1x128xf32> to vector<48x128xf32>
    %28 = arith.addf %25, %27 : vector<48x128xf32>
    %29 = arith.negf %28 : vector<48x128xf32>
    %30 = math.exp %29 : vector<48x128xf32>
    %cst_24 = arith.constant 1.000000e+00 : f32
    %31 = vector.broadcast %cst_24 : f32 to vector<48x128xf32>
    %32 = arith.addf %31, %30 : vector<48x128xf32>
    %33 = arith.divf %31, %32 : vector<48x128xf32>
    %c0_25 = arith.constant 0 : index
    %c0_26 = arith.constant 0 : index
    %34 = vector.load %arg11[%c0_25, %c0_26] : memref<48x128xf32, #tpu.memory_space<vmem>>, vector<48x128xf32>
    tpu.vector_store %arg11[%c0_25, %c0_26], %33 {strides = array<i32>} : memref<48x128xf32, #tpu.memory_space<vmem>>, vector<48x128xf32>,
    return
  }
  func.func @transform_0(%arg0: i32) -> (i32, i32) {
    %c0_i32 = arith.constant 0 : i32
    %c0_i32_0 = arith.constant 0 : i32
    return %arg0, %c0_i32 : i32, i32
  }
  func.func @transform_1(%arg0: i32) -> (i32, i32) {
    %c0_i32 = arith.constant 0 : i32
    %c0_i32_0 = arith.constant 0 : i32
    %c0_i32_1 = arith.constant 0 : i32
    return %c0_i32, %c0_i32_0 : i32, i32
  }
  func.func @transform_2(%arg0: i32) -> (i32, i32) {
    %c0_i32 = arith.constant 0 : i32
    %c0_i32_0 = arith.constant 0 : i32
    %c0_i32_1 = arith.constant 0 : i32
    return %c0_i32, %c0_i32_0 : i32, i32
  }
  func.func @transform_3(%arg0: i32) -> (i32, i32) {
    %c0_i32 = arith.constant 0 : i32
    %c0_i32_0 = arith.constant 0 : i32
    %c0_i32_1 = arith.constant 0 : i32
    return %c0_i32, %c0_i32_0 : i32, i32
  }
  func.func @transform_4(%arg0: i32) -> (i32, i32) {
    %c0_i32 = arith.constant 0 : i32
    %c0_i32_0 = arith.constant 0 : i32
    %c0_i32_1 = arith.constant 0 : i32
    return %c0_i32, %c0_i32_0 : i32, i32
  }
  func.func @transform_5(%arg0: i32) -> (i32, i32) {
    %c0_i32 = arith.constant 0 : i32
    %c0_i32_0 = arith.constant 0 : i32
    %c0_i32_1 = arith.constant 0 : i32
    return %c0_i32, %c0_i32_0 : i32, i32
  }
  func.func @transform_6(%arg0: i32) -> (i32, i32) {
    %c0_i32 = arith.constant 0 : i32
    %c0_i32_0 = arith.constant 0 : i32
    %c0_i32_1 = arith.constant 0 : i32
    return %c0_i32, %c0_i32_0 : i32, i32
  }
  func.func @transform_7(%arg0: i32) -> (i32, i32) {
    %c0_i32 = arith.constant 0 : i32
    %c0_i32_0 = arith.constant 0 : i32
    %c0_i32_1 = arith.constant 0 : i32
    return %c0_i32, %c0_i32_0 : i32, i32
  }
  func.func @transform_8(%arg0: i32) -> (i32, i32) {
    %c0_i32 = arith.constant 0 : i32
    %c0_i32_0 = arith.constant 0 : i32
    %c0_i32_1 = arith.constant 0 : i32
    return %c0_i32, %c0_i32_0 : i32, i32
  }
  func.func @transform_9(%arg0: i32) -> (i32, i32) {
    %c0_i32 = arith.constant 0 : i32
    %c0_i32_0 = arith.constant 0 : i32
    return %arg0, %c0_i32 : i32, i32
  }
  func.func @transform_10(%arg0: i32) -> (i32, i32) {
    %c0_i32 = arith.constant 0 : i32
    %c0_i32_0 = arith.constant 0 : i32
    return %arg0, %c0_i32 : i32, i32
  }
}

</mosaic_0001>

<bundles_post_ra>
// kernel: detr_forward.3
= control target key start
LH: loop header
LB: loop body
LE: loop exit
PB: predicated region body
PF: predicated region fallthrough
CT: control target
= control target key end

     0   :  { %vm72_vm0 = vcmask 1043456   ;;  %vm47_vm1 = vcmask 64512   ;;  %vm157_vm2 = vcmask 261120   ;;  %s407_s2 = inlined_call_operand.vmem [shape: bf16[8,32], index: 2, kind: input, shape index: {}]   ;;  %s408_s0 = inlined_call_operand.vmem [shape: f32[128,8], index: 0, kind: input, shape index: {}]   ;;  %s409_s3 = inlined_call_operand.vmem [shape: f32[1,32], index: 3, kind: input, shape index: {}]   ;;  %s410_s1 = inlined_call_operand.vmem [shape: f32[128,32], index: 1, kind: input, shape index: {}]   ;;  %s411_s4 = inlined_call_operand.vmem [shape: f32[128,32], index: 4, kind: output, shape index: {}]  }
   0x1   :  { %v42_v0 = vld [vmem:[%s407_s2] sm:$0xf]  ;;  %v19_v2 = vld [vmem:[%s408_s0 + $0x8] sm:$0xff]  ;;  %v20_v14 = vld [vmem:[%s408_s0 + $0x10] sm:$0xff] }
   0x2   :  { %v18_v1 = vld [vmem:[%s408_s0] sm:$0xff]  ;;  %v74_v3 = vsel %vm72_vm0, %v42_v0, 0  ;;  %v23_v6 = vld [vmem:[%s408_s0 + $0x28] sm:$0xff]  ;;  %v21_v15 = vld [vmem:[%s408_s0 + $0x18] sm:$0xff] }
   0x3   :  { %v34_v4 = vpack.c.bf16 %v19_v2, %v18_v1  ;;  %v22_v5 = vld [vmem:[%s408_s0 + $0x20] sm:$0xff]  ;;  %83 = vmatpush.bf16.msra.mxu0 %v74_v3  ;;  %186 = vmatpush.bf16.msra.mxu1 %v74_v3  ;;  %v27_v9 = vld [vmem:[%s408_s0 + $0x48] sm:$0xff]  ;;  %v24_v16 = vld [vmem:[%s408_s0 + $0x30] sm:$0xff]  ;;  %v35_v22 = vpack.c.bf16 %v21_v15, %v20_v14 }
   0x4   :  { %v26_v7 = vld [vmem:[%s408_s0 + $0x40] sm:$0xff]  ;;  %v36_v8 = vpack.c.bf16 %v23_v6, %v22_v5  ;;  %v31_v11 = vld [vmem:[%s408_s0 + $0x68] sm:$0xff]  ;;  %187 = vmatpush.bf16.msra.mxu2 %v74_v3  ;;  %188 = vmatpush.bf16.msra.mxu3 %v74_v3  ;;  %v25_v17 = vld [vmem:[%s408_s0 + $0x38] sm:$0xff] }
   0x5   :  { %v30_v10 = vld [vmem:[%s408_s0 + $0x60] sm:$0xff]  ;;  %v38_v12 = vpack.c.bf16 %v27_v9, %v26_v7  ;;  %v28_v18 = vld [vmem:[%s408_s0 + $0x50] sm:$0xff]  ;;  %v29_v19 = vld [vmem:[%s408_s0 + $0x58] sm:$0xff]  ;;  %v37_v23 = vpack.c.bf16 %v25_v17, %v24_v16 }
   0x6   :  { %v40_v13 = vpack.c.bf16 %v31_v11, %v30_v10  ;;  %178 = vmatmul.msk.bf16.vlgmr.msra.gmra.mxu0 %vm47_vm1, %v34_v4  ;;  %180 = vmatmul.msk.bf16.vlgmr.msra.gmra.mxu1 %vm47_vm1, %v36_v8  ;;  %v32_v20 = vld [vmem:[%s408_s0 + $0x70] sm:$0xff]  ;;  %v33_v21 = vld [vmem:[%s408_s0 + $0x78] sm:$0xff]  ;;  %v39_v24 = vpack.c.bf16 %v29_v19, %v28_v18  ;;  %v277_v26 = vld [vmem:[%s409_s3] ss:$0 sm:$0xff] }
   0x7   :  { %182 = vmatmul.msk.bf16.vlgmr.msra.gmra.mxu2 %vm47_vm1, %v38_v12  ;;  %v41_v25 = vpack.c.bf16 %v33_v21, %v32_v20  ;;  %v125_v28 = vld [vmem:[%s410_s1] sm:$0xff]  ;;  %v126_v42 = vld [vmem:[%s410_s1 + $0x8] sm:$0xff]  ;;  %v127_v58 = vld [vmem:[%s410_s1 + $0x10] sm:$0xff] }
   0x8   :  { %184 = vmatmul.msk.bf16.vlgmr.msra.gmra.mxu3 %vm47_vm1, %v40_v13  ;;  %v129_v30 = vld [vmem:[%s410_s1 + $0x20] sm:$0xff]  ;;  %v130_v44 = vld [vmem:[%s410_s1 + $0x28] sm:$0xff]  ;;  %v131_v60 = vld [vmem:[%s410_s1 + $0x30] sm:$0xff] }
   0x9   :  { %v133_v36 = vld [vmem:[%s410_s1 + $0x40] sm:$0xff]  ;;  %v134_v52 = vld [vmem:[%s410_s1 + $0x48] sm:$0xff]  ;;  %v135_v4 = vld [vmem:[%s410_s1 + $0x50] sm:$0xff] }
   0xa   :  { %v137_v38 = vld [vmem:[%s410_s1 + $0x60] sm:$0xff]  ;;  %v138_v54 = vld [vmem:[%s410_s1 + $0x68] sm:$0xff]  ;;  %v139_v6 = vld [vmem:[%s410_s1 + $0x70] sm:$0xff] }
   0xb   :  { %v128_v10 = vld [vmem:[%s410_s1 + $0x18] sm:$0xff] }
   0xc   :  { %v132_v12 = vld [vmem:[%s410_s1 + $0x38] sm:$0xff] }
   0xd   :  { %v136_v20 = vld [vmem:[%s410_s1 + $0x58] sm:$0xff] }
  0x16   :  { %179 = vmatmul.msk.bf16.gmra.mxu0 %vm47_vm1, %v35_v22  ;;  %181 = vmatmul.msk.bf16.gmra.mxu1 %vm47_vm1, %v37_v23  ;;  %v140_v22 = vld [vmem:[%s410_s1 + $0x78] sm:$0xff] }
  0x17   :  { %183 = vmatmul.msk.bf16.gmra.mxu2 %vm47_vm1, %v39_v24 }
  0x18   :  { %185 = vmatmul.msk.bf16.gmra.mxu3 %vm47_vm1, %v41_v25 }
  0x83   :  { %v85_v27 = vpop.f32.mrf.mxu0  ;;  %v95_v29 = vpop.f32.mrf.mxu1 }
  0x84   :  { %v86_v31 = vadd.f32 %v277_v26, %v85_v27  ;;  %v96_v32 = vadd.f32 %v277_v26, %v95_v29 }
  0x86   :  { %v141_v33 = vadd.f32 %v125_v28, %v86_v31  ;;  %v145_v34 = vadd.f32 %v129_v30, %v96_v32 }
  0x88   :  { %158 = vst.msk [vmem:[%s411_s4] sm:$0xff] %vm157_vm2, %v141_v33 }
  0x89   :  { %162 = vst.msk [vmem:[%s411_s4 + $0x20] sm:$0xff] %vm157_vm2, %v145_v34 }
  0x8a   :  { %v105_v35 = vpop.f32.mrf.mxu2 }
  0x8b   :  { %v115_v37 = vpop.f32.mrf.mxu3  ;;  %v106_v39 = vadd.f32 %v277_v26, %v105_v35  ;;  %v87_v41 = vpop.f32.mrf.mxu0 }
  0x8c   :  { %v116_v40 = vadd.f32 %v277_v26, %v115_v37  ;;  %v97_v43 = vpop.f32.mrf.mxu1  ;;  %v88_v45 = vadd.f32 %v277_v26, %v87_v41 }
  0x8d   :  { %v98_v46 = vadd.f32 %v277_v26, %v97_v43  ;;  %v149_v47 = vadd.f32 %v133_v36, %v106_v39 }
  0x8e   :  { %v153_v48 = vadd.f32 %v137_v38, %v116_v40  ;;  %v142_v49 = vadd.f32 %v126_v42, %v88_v45 }
  0x8f   :  { %v146_v50 = vadd.f32 %v130_v44, %v98_v46  ;;  %166 = vst.msk [vmem:[%s411_s4 + $0x40] sm:$0xff] %vm157_vm2, %v149_v47 }
  0x90   :  { %170 = vst.msk [vmem:[%s411_s4 + $0x60] sm:$0xff] %vm157_vm2, %v153_v48 }
  0x91   :  { %159 = vst.msk [vmem:[%s411_s4 + $0x8] sm:$0xff] %vm157_vm2, %v142_v49 }
  0x92   :  { %163 = vst.msk [vmem:[%s411_s4 + $0x28] sm:$0xff] %vm157_vm2, %v146_v50  ;;  %v107_v51 = vpop.f32.mrf.mxu2 }
  0x93   :  { %v117_v53 = vpop.f32.mrf.mxu3  ;;  %v108_v55 = vadd.f32 %v277_v26, %v107_v51  ;;  %v90_v57 = vpop.f32.mrf.mxu0 }
  0x94   :  { %v118_v56 = vadd.f32 %v277_v26, %v117_v53  ;;  %v100_v59 = vpop.f32.mrf.mxu1  ;;  %v91_v61 = vadd.f32 %v277_v26, %v90_v57 }
  0x95   :  { %v101_v62 = vadd.f32 %v277_v26, %v100_v59  ;;  %v150_v63 = vadd.f32 %v134_v52, %v108_v55 }
  0x96   :  { %v154_v0 = vadd.f32 %v138_v54, %v118_v56  ;;  %v143_v1 = vadd.f32 %v127_v58, %v91_v61 }
  0x97   :  { %v147_v2 = vadd.f32 %v131_v60, %v101_v62  ;;  %167 = vst.msk [vmem:[%s411_s4 + $0x48] sm:$0xff] %vm157_vm2, %v150_v63 }
  0x98   :  { %171 = vst.msk [vmem:[%s411_s4 + $0x68] sm:$0xff] %vm157_vm2, %v154_v0 }
  0x99   :  { %160 = vst.msk [vmem:[%s411_s4 + $0x10] sm:$0xff] %vm157_vm2, %v143_v1 }
  0x9a   :  { %164 = vst.msk [vmem:[%s411_s4 + $0x30] sm:$0xff] %vm157_vm2, %v147_v2  ;;  %v110_v3 = vpop.f32.mrf.mxu2 }
  0x9b   :  { %v120_v5 = vpop.f32.mrf.mxu3  ;;  %v111_v7 = vadd.f32 %v277_v26, %v110_v3  ;;  %v92_v9 = vpop.f32.mrf.mxu0 }
  0x9c   :  { %v121_v8 = vadd.f32 %v277_v26, %v120_v5  ;;  %v102_v11 = vpop.f32.mrf.mxu1  ;;  %v93_v13 = vadd.f32 %v277_v26, %v92_v9 }
  0x9d   :  { %v103_v14 = vadd.f32 %v277_v26, %v102_v11  ;;  %v151_v15 = vadd.f32 %v135_v4, %v111_v7 }
  0x9e   :  { %v155_v16 = vadd.f32 %v139_v6, %v121_v8  ;;  %v144_v17 = vadd.f32 %v128_v10, %v93_v13 }
  0x9f   :  { %v148_v18 = vadd.f32 %v132_v12, %v103_v14  ;;  %168 = vst.msk [vmem:[%s411_s4 + $0x50] sm:$0xff] %vm157_vm2, %v151_v15 }
  0xa0   :  { %172 = vst.msk [vmem:[%s411_s4 + $0x70] sm:$0xff] %vm157_vm2, %v155_v16 }
  0xa1   :  { %161 = vst.msk [vmem:[%s411_s4 + $0x18] sm:$0xff] %vm157_vm2, %v144_v17 }
  0xa2   :  { %165 = vst.msk [vmem:[%s411_s4 + $0x38] sm:$0xff] %vm157_vm2, %v148_v18  ;;  %v112_v19 = vpop.f32.mrf.mxu2 }
  0xa3   :  { %v122_v21 = vpop.f32.mrf.mxu3  ;;  %v113_v23 = vadd.f32 %v277_v26, %v112_v19 }
  0xa4   :  { %v123_v24 = vadd.f32 %v277_v26, %v122_v21 }
  0xa5   :  { %v152_v25 = vadd.f32 %v136_v20, %v113_v23 }
  0xa6   :  { %v156_v27 = vadd.f32 %v140_v22, %v123_v24 }
  0xa7   :  { %169 = vst.msk [vmem:[%s411_s4 + $0x58] sm:$0xff] %vm157_vm2, %v152_v25 }
  0xa8   :  { %173 = vst.msk [vmem:[%s411_s4 + $0x78] sm:$0xff] %vm157_vm2, %v156_v27 }

// kernel: detr_forward.4
= control target key start
LH: loop header
LB: loop body
LE: loop exit
PB: predicated region body
PF: predicated region fallthrough
CT: control target
= control target key end

     0   :  { %s509_s9 = smov 0   ;;  %s511_s10 = smov 0   ;;  %s590_s0 = inlined_call_operand.vmem [shape: f32[2,64,32], index: 0, kind: input, shape index: {}]   ;;  %s591_s1 = inlined_call_operand.vmem [shape: f32[8,32], index: 1, kind: input, shape index: {}]   ;;  %s592_s2 = inlined_call_operand.vmem [shape: f32[3,2,8,32], index: 2, kind: output, shape index: {}]  }
   0x1   :  { %s513_s11 = smov 0  }
   0x2 LB: > { %s522_s12 = sadd.s32 4294967295, %s492_s11   ;;  %s524_s13 = sadd.s32 1, %s492_s11   ;;  %s492_s11 = sphi %s513_s11, %s596_s11   ;;  %s488_s10 = sphi %s511_s10, %s595_s10   ;;  %s484_s9 = sphi %s509_s9, %s594_s9  }
   0x3   : > { %s63_s14 = ssub.s32 %s492_s11, %s524_s13  ;;  %s66_s15 = sadd.s32 1, %s488_s10 }
   0x4   : > { %p64_p0 = scmp.eq.s32.totalorder %s63_s14, 0  ;;  %p76_p1 = scmp.ne.s32.totalorder %s488_s10, %s484_s9 }
   0x5   : > { %p77_p2 = scmp.eq.s32.totalorder %s522_s12, 1  ;;  %p418_p3 = scmp.ge.s32.totalorder %s492_s11, 1 }
   0x6   : > { %s532_s16 = scalar_select %p64_p0, %s488_s10, %s66_s15  }
   0x7   : > { %p534_p4 = por %p77_p2, %p76_p1  ;;  %p112_p5 = scmp.lt.s32.totalorder %s492_s11, 3 }
   0x9   : > { %p113_p6 = pnand %p418_p3, %p112_p5 }
   0xa   : > { %p133_p7 = scmp.lt.s32.totalorder (!%p113_p6), %s522_s12, 1  ;;  %s130_s25 = sand.u32 (!%p113_p6), 1, %s484_s9  }
   0xb   : > { %116 = sbr.rel (%p113_p6) target bundleno = 1624 (0x658), region = 28 }
   0xc   : > { %s433_s26 = smul.u32 (!%p113_p6), 24, %s130_s25 }
   0xe   : > { %s555_s27 = scalar_lea.vmem (!%p113_p6), [#allocation2], %s433_s26 }
  0x10   : > { %s134_s18 = scalar_select %p133_p7, %s522_s12, 1  ;;  %vm154_vm0 = vcmask 261120   ;;  %v151_v16 = vld [vmem:[%s591_s1] sm:$0xff]  ;;  %vm184_vm1 = vcmask 523264  }
  0x11   : > { %v153_v17 = vpack.c.bf16 %v151_v16, %v151_v16  ;;  %s429_s28 = sshll.u32 (%p534_p4), %s522_s12, 3 }
  0x12   : > { %s432_s19 = sshll.u32 %s134_s18, 6  ;;  %s322_s3 = scalar_lea.vmem (%p534_p4), %s592_s2, %s429_s28 }
  0x13   : > { %s137_s22 = scalar_lea.vmem %s590_s0, %s432_s19 }
  0x14   : > { %v145_v0 = vld [vmem:[%s137_s22 + $0x30] sm:$0xff]  ;;  %v146_v1 = vld [vmem:[%s137_s22 + $0x38] sm:$0xff]  ;;  %v143_v3 = vld [vmem:[%s137_s22 + $0x20] sm:$0xff] }
  0x15   : > { %v150_v2 = vpack.c.bf16 %v146_v1, %v145_v0  ;;  %v144_v4 = vld [vmem:[%s137_s22 + $0x28] sm:$0xff]  ;;  %v141_v7 = vld [vmem:[%s137_s22 + $0x10] sm:$0xff]  ;;  %v142_v8 = vld [vmem:[%s137_s22 + $0x18] sm:$0xff] }
  0x16   : > { %v149_v6 = vpack.c.bf16 %v144_v4, %v143_v3  ;;  %v148_v10 = vpack.c.bf16 %v142_v8, %v141_v7  ;;  %v139_v11 = vld [vmem:[%s137_s22] sm:$0xff]  ;;  %v140_v12 = vld [vmem:[%s137_s22 + $0x8] sm:$0xff] }
  0x17   : > { %v168_v5 = vsel %vm154_vm0, %v150_v2, 0  ;;  %204 = vmatpush.bf16.msra.mxu1 %v150_v2  ;;  %252 = vmatpush.bf16.msra.mxu3 %v150_v2  ;;  %v147_v13 = vpack.c.bf16 %v140_v12, %v139_v11 }
  0x18   : > { %174 = vmatpush.bf16.xpose.msra.mxu0 %v168_v5  ;;  %223 = vmatpush.bf16.xpose.msra.mxu2 %v168_v5  ;;  %v165_v9 = vsel %vm154_vm0, %v149_v6, 0  ;;  %v162_v14 = vsel %vm154_vm0, %v148_v10, 0 }
  0x19   : > { %v159_v15 = vsel %vm154_vm0, %v147_v13, 0 }
  0x1b   : > { %205 = vmatpush.bf16.msra.mxu1 %v149_v6  ;;  %253 = vmatpush.bf16.msra.mxu3 %v149_v6 }
  0x1f   : > { %206 = vmatpush.bf16.msra.mxu1 %v148_v10  ;;  %254 = vmatpush.bf16.msra.mxu3 %v148_v10 }
  0x20   : > { %175 = vmatpush.bf16.xpose.msra.mxu0 %v165_v9  ;;  %224 = vmatpush.bf16.xpose.msra.mxu2 %v165_v9 }
  0x23   : > { %207 = vmatpush.bf16.msra.mxu1 %v147_v13  ;;  %255 = vmatpush.bf16.msra.mxu3 %v147_v13 }
  0x27   : > { %273 = vmatpush.bf16.xpose.msrb.mxu1 %v168_v5  ;;  %302 = vmatpush.bf16.msrb.mxu3 %v150_v2 }
  0x28   : > { %176 = vmatpush.bf16.xpose.msra.mxu0 %v162_v14  ;;  %225 = vmatpush.bf16.xpose.msra.mxu2 %v162_v14 }
  0x2b   : > { %303 = vmatpush.bf16.msrb.mxu3 %v149_v6 }
  0x2f   : > { %274 = vmatpush.bf16.xpose.msrb.mxu1 %v165_v9  ;;  %304 = vmatpush.bf16.msrb.mxu3 %v148_v10 }
  0x30   : > { %177 = vmatpush.bf16.xpose.msra.mxu0 %v159_v15  ;;  %226 = vmatpush.bf16.xpose.msra.mxu2 %v159_v15 }
  0x33   : > { %305 = vmatpush.bf16.msrb.mxu3 %v147_v13 }
  0x37   : > { %275 = vmatpush.bf16.xpose.msrb.mxu1 %v162_v14  ;;  %421 = vmatmul.msk.bf16.vlgmr.msra.gmra.mxu0 %vm154_vm0, %v153_v17 }
  0x3f   : > { %276 = vmatpush.bf16.xpose.msrb.mxu1 %v159_v15 }
  0xb4   : > { %v179_v18 = vpop.f32.mrf.mxu0 }
  0xb5   : > { %v183_v19 = vmul.f32 0.17677669, %v179_v18 }
  0xb7   : > { %v185_v20 = vsel %vm184_vm1, %v183_v19, -inf }
  0xb8   : > { %186 = vmax.xlane.f32.xlu0 %v185_v20 }
  0xbc   : > { %v181_v21 = vpop.f32.mrf.mxu0 }
 0x12b   : > { %v187_v22 = vpop.xlane.xlu0 %186 }
 0x12c   : > { %v188_v23 = vsub.f32 %v183_v19, %v187_v22 }
 0x12e   : > { %v189_v24 = vmul.f32 1.442695, %v188_v23 }
 0x130   : > { %458 = vpow2.f32 %v189_v24 }
 0x136   : > { %v459_v25 = vpop.eup %458 }
 0x137   : > { %v191_v26 = vsel %vm184_vm1, %v459_v25, 0.0 }
 0x138   : > { %192 = vadd.xlane.f32.xlu0 %v191_v26 }
 0x1ab   : > { %v193_v27 = vpop.xlane.xlu0 %192 }
 0x1ac   : > { %460 = vrcp.f32 %v193_v27 }
 0x1b2   : > { %v461_v28 = vpop.eup %460 }
 0x1b3   : > { %v195_v29 = vmul.f32 %v461_v28, %v459_v25 }
 0x1b5   : > { %v196_v30 = vpack.c.bf16 %v195_v29, %v195_v29 }
 0x1b7   : > { %422 = vmatmul.msk.bf16.vlgmr.msra.gmra.mxu1 %vm184_vm1, %v196_v30 }
 0x234   : > { %v209_v31 = vpop.f32.mrf.mxu1 }
 0x235   : > { %213 = vst.msk [vmem:[%s555_s27] sm:$0xff] %vm154_vm0, %v209_v31  ;;  %v214_v32 = vadd.f32 %v209_v31, %v151_v16 }
 0x237   : > { %v215_v33 = vpack.c.bf16 %v214_v32, %v214_v32 }
 0x239   : > { %423 = vmatmul.msk.bf16.vlgmr.msra.gmra.mxu2 %vm154_vm0, %v215_v33 }
 0x23c   : > { %v211_v34 = vpop.f32.mrf.mxu1  ;;  %v355_v5 = vld [vmem:[%s555_s27] sm:$0xff] (%p534_p4) }
 0x23d   : > { %356 = vst [vmem:[%s322_s3] sm:$0xff] (%p534_p4), %v355_v5 }
 0x2bc   : > { %v228_v35 = vpop.f32.mrf.mxu2 }
 0x2bd   : > { %v232_v36 = vmul.f32 0.17677669, %v228_v35 }
 0x2bf   : > { %v233_v37 = vsel %vm184_vm1, %v232_v36, -inf }
 0x2c0   : > { %234 = vmax.xlane.f32.xlu1 %v233_v37 }
 0x2c4   : > { %v230_v38 = vpop.f32.mrf.mxu2 }
 0x333   : > { %v235_v39 = vpop.xlane.xlu1 %234 }
 0x334   : > { %v236_v40 = vsub.f32 %v232_v36, %v235_v39 }
 0x336   : > { %v237_v41 = vmul.f32 1.442695, %v236_v40 }
 0x338   : > { %462 = vpow2.f32 %v237_v41 }
 0x33e   : > { %v463_v42 = vpop.eup %462 }
 0x33f   : > { %v239_v43 = vsel %vm184_vm1, %v463_v42, 0.0 }
 0x340   : > { %240 = vadd.xlane.f32.xlu1 %v239_v43 }
 0x3b3   : > { %v241_v44 = vpop.xlane.xlu1 %240 }
 0x3b4   : > { %464 = vrcp.f32 %v241_v44 }
 0x3ba   : > { %v465_v45 = vpop.eup %464 }
 0x3bb   : > { %v243_v46 = vmul.f32 %v465_v45, %v463_v42 }
 0x3bd   : > { %v244_v47 = vpack.c.bf16 %v243_v46, %v243_v46 }
 0x3bf   : > { %424 = vmatmul.msk.bf16.vlgmr.msra.gmra.mxu3 %vm184_vm1, %v244_v47 }
 0x442   : > { %v257_v48 = vpop.f32.mrf.mxu3 }
 0x443   : > { %v261_v49 = vadd.f32 %v257_v48, %v209_v31 }
 0x445   : > { %425 = vst.msk [vmem:[%s555_s27 + $0x8] sm:$0xff] %vm154_vm0, %v261_v49  ;;  %v264_v50 = vadd.f32 %v261_v49, %v151_v16 }
 0x447   : > { %v265_v51 = vpack.c.bf16 %v264_v50, %v264_v50 }
 0x449   : > { %426 = vmatmul.msk.bf16.vlgmr.msrb.gmra.mxu1 %vm154_vm0, %v265_v51 }
 0x44a   : > { %v259_v52 = vpop.f32.mrf.mxu3 }
 0x44c   : > { %v357_v6 = vld [vmem:[%s555_s27 + $0x8] sm:$0xff] (%p534_p4) }
 0x44d   : > { %358 = vst [vmem:[%s322_s3 + $0x10] sm:$0xff] (%p534_p4), %v357_v6 }
 0x4c6   : > { %v278_v53 = vpop.f32.mrf.mxu1 }
 0x4c7   : > { %v282_v54 = vmul.f32 0.17677669, %v278_v53 }
 0x4c9   : > { %v283_v55 = vsel %vm184_vm1, %v282_v54, -inf }
 0x4ca   : > { %284 = vmax.xlane.f32.xlu2 %v283_v55 }
 0x4ce   : > { %v280_v56 = vpop.f32.mrf.mxu1 }
 0x53d   : > { %v285_v57 = vpop.xlane.xlu2 %284 }
 0x53e   : > { %v286_v58 = vsub.f32 %v282_v54, %v285_v57 }
 0x540   : > { %v287_v59 = vmul.f32 1.442695, %v286_v58 }
 0x542   : > { %466 = vpow2.f32 %v287_v59 }
 0x548   : > { %v467_v60 = vpop.eup %466 }
 0x549   : > { %v289_v61 = vsel %vm184_vm1, %v467_v60, 0.0 }
 0x54a   : > { %290 = vadd.xlane.f32.xlu2 %v289_v61 }
 0x5bd   : > { %v291_v62 = vpop.xlane.xlu2 %290 }
 0x5be   : > { %468 = vrcp.f32 %v291_v62 }
 0x5c4   : > { %v469_v63 = vpop.eup %468 }
 0x5c5   : > { %v293_v0 = vmul.f32 %v469_v63, %v467_v60 }
 0x5c7   : > { %v294_v1 = vpack.c.bf16 %v293_v0, %v293_v0 }
 0x5c9   : > { %427 = vmatmul.msk.bf16.vlgmr.msrb.gmra.mxu3 %vm184_vm1, %v294_v1 }
 0x64c   : > { %v307_v2 = vpop.f32.mrf.mxu3 }
 0x64d   : > { %v311_v3 = vadd.f32 %v307_v2, %v261_v49 }
 0x64f   : > { %428 = vst.msk [vmem:[%s555_s27 + $0x10] sm:$0xff] %vm154_vm0, %v311_v3 }
 0x650   : > { %320 = sbr.rel (!%p534_p4) target bundleno = 1624 (0x658), region = 32 }
 0x654   : > { %v309_v4 = vpop.f32.mrf.mxu3 }
 0x656   : > { %v359_v7 = vld [vmem:[%s555_s27 + $0x10] sm:$0xff] }
 0x657   : > { %360 = vst [vmem:[%s322_s3 + $0x20] sm:$0xff] %v359_v7 }
 0x658 PF: > { %p9_p8 = scmp.ge.s32.totalorder %s524_s13, 4   ;;  %s594_s9 = smov %s488_s10 }
 0x659   : > { %s595_s10 = smov %s532_s16  ;;  %s596_s11 = smov %s524_s13 }
 0x65a   :  { %11 = sbr.rel (!%p9_p8) target bundleno = 2 (0x2), region = 98 }

// kernel: detr_forward.5
= control target key start
LH: loop header
LB: loop body
LE: loop exit
PB: predicated region body
PF: predicated region fallthrough
CT: control target
= control target key end

     0   :  { %vm64_vm0 = vcmask 261120   ;;  %s655_s1 = inlined_call_operand.vmem [shape: bf16[32,32], index: 1, kind: input, shape index: {}]   ;;  %s656_s0 = inlined_call_operand.vmem [shape: f32[48,32], index: 0, kind: input, shape index: {}]   ;;  %s657_s2 = inlined_call_operand.vmem [shape: f32[1,32], index: 2, kind: input, shape index: {}]   ;;  %s658_s4 = inlined_call_operand.vmem [shape: f32[1,32], index: 4, kind: input, shape index: {}]   ;;  %s659_s3 = inlined_call_operand.vmem [shape: bf16[32,32], index: 3, kind: input, shape index: {}]   ;;  %s660_s8 = inlined_call_operand.vmem [shape: f32[1,128], index: 8, kind: input, shape index: {}]   ;;  %s661_s7 = inlined_call_operand.vmem [shape: bf16[32,128], index: 7, kind: input, shape index: {}]   ;;  %s662_s5 = inlined_call_operand.vmem [shape: bf16[32,128], index: 5, kind: input, shape index: {}]   ;;  %s663_s6 = inlined_call_operand.vmem [shape: f32[1,128], index: 6, kind: input, shape index: {}]   ;;  %s664_s9 = inlined_call_operand.vmem [shape: f32[48,128], index: 9, kind: output, shape index: {0}]   ;;  %s665_s10 = inlined_call_operand.vmem [shape: f32[48,128], index: 10, kind: output, shape index: {1}]  }
   0x1   :  { %v453_v0 = vld [vmem:[%s655_s1 + $0x8] sm:$0xff]  ;;  %v452_v1 = vld [vmem:[%s655_s1] sm:$0xff]  ;;  %v37_v5 = vld [vmem:[%s656_s0 + $0x10] sm:$0xff] }
   0x2   :  { %130 = vmatpush.bf16.msra.mxu1 %v453_v0  ;;  %v35_v2 = vld [vmem:[%s656_s0] sm:$0xff]  ;;  %v36_v3 = vld [vmem:[%s656_s0 + $0x8] sm:$0xff]  ;;  %v38_v6 = vld [vmem:[%s656_s0 + $0x18] sm:$0xff] }
   0x3   :  { %v41_v4 = vpack.c.bf16 %v36_v3, %v35_v2  ;;  %v42_v7 = vpack.c.bf16 %v38_v6, %v37_v5  ;;  %v39_v8 = vld [vmem:[%s656_s0 + $0x20] sm:$0xff]  ;;  %v40_v9 = vld [vmem:[%s656_s0 + $0x28] sm:$0xff] }
   0x4   :  { %v567_v10 = vpack.c.bf16 %v40_v9, %v39_v8  ;;  %v455_v11 = vld [vmem:[%s659_s3 + $0x8] sm:$0xff]  ;;  %v454_v12 = vld [vmem:[%s659_s3] sm:$0xff] }
   0x5   :  { %192 = vmatpush.bf16.msra.mxu2 %v455_v11  ;;  %v458_v14 = vld [vmem:[%s657_s2] ss:$0 sm:$0xff]  ;;  %v457_v35 = vld [vmem:[%s661_s7 + $0x8] sm:$0xff] }
   0x6   :  { %131 = vmatpush.bf16.msra.mxu1 %v452_v1  ;;  %254 = vmatpush.bf16.msra.mxu3 %v457_v35  ;;  %v456_v36 = vld [vmem:[%s661_s7] sm:$0xff]  ;;  %v451_v38 = vld [vmem:[%s662_s5 + $0x8] sm:$0xff] }
   0x7   :  { %80 = vmatpush.bf16.msra.mxu0 %v451_v38  ;;  %v459_v39 = vld [vmem:[%s658_s4] ss:$0 sm:$0xff] }
   0x8   :  { %v450_v40 = vld [vmem:[%s662_s5] sm:$0xff] }
   0x9   :  { %419 = vmatmul.msk.bf16.vlgmr.msra.gmra.mxu1 %vm64_vm0, %v41_v4  ;;  %193 = vmatpush.bf16.msra.mxu2 %v454_v12  ;;  %v461_v62 = vld [vmem:[%s663_s6] ss:$0 sm:$0xff] }
   0xa   :  { %255 = vmatpush.bf16.msra.mxu3 %v456_v36  ;;  %v611_v63 = vld [vmem:[%s660_s8] ss:$0 sm:$0xff] }
   0xb   :  { %81 = vmatpush.bf16.msra.mxu0 %v450_v40 }
   0xe   :  { %408 = vmatmul.msk.bf16.vlgmr.msra.gmra.mxu0 %vm64_vm0, %v41_v4 }
  0x19   :  { %420 = vmatmul.msk.bf16.gmra.mxu1 %vm64_vm0, %v42_v7 }
  0x1e   :  { %409 = vmatmul.msk.bf16.gmra.mxu0 %vm64_vm0, %v42_v7 }
  0x29   :  { %421 = vmatmul.msk.bf16.gmra.mxu1 %vm64_vm0, %v567_v10 }
  0x2e   :  { %410 = vmatmul.msk.bf16.gmra.mxu0 %vm64_vm0, %v567_v10 }
  0x86   :  { %v133_v13 = vpop.f32.mrf.mxu1 }
  0x87   :  { %v134_v15 = vadd.f32 %v458_v14, %v133_v13 }
  0x89   :  { %v148_v18 = vmax.f32 %v134_v15, 0.0 }
  0x8b   :  { %v83_v61 = vpop.f32.mrf.mxu0 }
  0x8c   :  { %v84_v1 = vadd.f32 %v461_v62, %v83_v61 }
  0x8e   :  { %v135_v16 = vpop.f32.mrf.mxu1  ;;  %98 = vst [vmem:[%s664_s9] sm:$0xff] %v84_v1 }
  0x8f   :  { %v136_v17 = vadd.f32 %v458_v14, %v135_v16 }
  0x91   :  { %v149_v19 = vmax.f32 %v136_v17, 0.0 }
  0x93   :  { %v154_v20 = vpack.c.bf16 %v149_v19, %v148_v18  ;;  %v85_v0 = vpop.f32.mrf.mxu0 }
  0x94   :  { %v86_v2 = vadd.f32 %v461_v62, %v85_v0 }
  0x95   :  { %430 = vmatmul.msk.bf16.vlgmr.msra.gmra.mxu2 %vm64_vm0, %v154_v20 }
  0x96   :  { %v138_v21 = vpop.f32.mrf.mxu1  ;;  %99 = vst [vmem:[%s664_s9 + $0x8] sm:$0xff] %v86_v2 }
  0x97   :  { %v139_v22 = vadd.f32 %v458_v14, %v138_v21 }
  0x99   :  { %v150_v25 = vmax.f32 %v139_v22, 0.0 }
  0x9b   :  { %v88_v6 = vpop.f32.mrf.mxu0 }
  0x9c   :  { %v89_v13 = vadd.f32 %v461_v62, %v88_v6 }
  0x9e   :  { %v140_v23 = vpop.f32.mrf.mxu1  ;;  %100 = vst [vmem:[%s664_s9 + $0x10] sm:$0xff] %v89_v13 }
  0x9f   :  { %v141_v24 = vadd.f32 %v458_v14, %v140_v23 }
  0xa1   :  { %v151_v26 = vmax.f32 %v141_v24, 0.0 }
  0xa3   :  { %v155_v27 = vpack.c.bf16 %v151_v26, %v150_v25  ;;  %v90_v12 = vpop.f32.mrf.mxu0 }
  0xa5   :  { %431 = vmatmul.msk.bf16.gmra.mxu2 %vm64_vm0, %v155_v27 }
  0xa6   :  { %v143_v28 = vpop.f32.mrf.mxu1 }
  0xa7   :  { %v144_v29 = vadd.f32 %v458_v14, %v143_v28 }
  0xa9   :  { %v152_v32 = vmax.f32 %v144_v29, 0.0 }
  0xab   :  { %v93_v22 = vpop.f32.mrf.mxu0 }
  0xac   :  { %v94_v40 = vadd.f32 %v461_v62, %v93_v22 }
  0xae   :  { %v145_v30 = vpop.f32.mrf.mxu1  ;;  %102 = vst [vmem:[%s664_s9 + $0x20] sm:$0xff] %v94_v40 }
  0xaf   :  { %v146_v31 = vadd.f32 %v458_v14, %v145_v30  ;;  %v91_v14 = vadd.f32 %v461_v62, %v90_v12 }
  0xb1   :  { %v153_v33 = vmax.f32 %v146_v31, 0.0  ;;  %101 = vst [vmem:[%s664_s9 + $0x18] sm:$0xff] %v91_v14 }
  0xb3   :  { %v156_v34 = vpack.c.bf16 %v153_v33, %v152_v32 }
  0xb5   :  { %432 = vmatmul.msk.bf16.gmra.mxu2 %vm64_vm0, %v156_v34 }
 0x118   :  { %v195_v37 = vpop.f32.mrf.mxu2 }
 0x119   :  { %v196_v41 = vadd.f32 %v459_v39, %v195_v37  ;;  %v95_v37 = vpop.f32.mrf.mxu0 }
 0x11b   :  { %v210_v44 = vmax.f32 %v196_v41, 0.0  ;;  %v96_v41 = vadd.f32 %v461_v62, %v95_v37 }
 0x11d   :  { %103 = vst [vmem:[%s664_s9 + $0x28] sm:$0xff] %v96_v41 }
 0x120   :  { %v197_v42 = vpop.f32.mrf.mxu2 }
 0x121   :  { %v198_v43 = vadd.f32 %v459_v39, %v197_v42 }
 0x123   :  { %v211_v45 = vmax.f32 %v198_v43, 0.0 }
 0x125   :  { %v216_v46 = vpack.c.bf16 %v211_v45, %v210_v44 }
 0x127   :  { %441 = vmatmul.msk.bf16.vlgmr.msra.gmra.mxu3 %vm64_vm0, %v216_v46 }
 0x128   :  { %v200_v47 = vpop.f32.mrf.mxu2 }
 0x129   :  { %v201_v48 = vadd.f32 %v459_v39, %v200_v47 }
 0x12b   :  { %v212_v51 = vmax.f32 %v201_v48, 0.0 }
 0x130   :  { %v202_v49 = vpop.f32.mrf.mxu2 }
 0x131   :  { %v203_v50 = vadd.f32 %v459_v39, %v202_v49 }
 0x133   :  { %v213_v52 = vmax.f32 %v203_v50, 0.0 }
 0x135   :  { %v217_v53 = vpack.c.bf16 %v213_v52, %v212_v51 }
 0x137   :  { %442 = vmatmul.msk.bf16.gmra.mxu3 %vm64_vm0, %v217_v53 }
 0x138   :  { %v205_v54 = vpop.f32.mrf.mxu2 }
 0x139   :  { %v206_v55 = vadd.f32 %v459_v39, %v205_v54 }
 0x13b   :  { %v214_v58 = vmax.f32 %v206_v55, 0.0 }
 0x140   :  { %v207_v56 = vpop.f32.mrf.mxu2 }
 0x141   :  { %v208_v57 = vadd.f32 %v459_v39, %v207_v56 }
 0x143   :  { %v215_v59 = vmax.f32 %v208_v57, 0.0 }
 0x145   :  { %v218_v60 = vpack.c.bf16 %v215_v59, %v214_v58 }
 0x147   :  { %443 = vmatmul.msk.bf16.gmra.mxu3 %vm64_vm0, %v218_v60 }
 0x1aa   :  { %v257_v3 = vpop.f32.mrf.mxu3 }
 0x1ab   :  { %v258_v4 = vadd.f32 %v611_v63, %v257_v3 }
 0x1ad   :  { %v444_v5 = vmul.f32 -1.442695, %v258_v4 }
 0x1af   :  { %462 = vpow2.f32 %v444_v5 }
 0x1b2   :  { %v259_v7 = vpop.f32.mrf.mxu3 }
 0x1b3   :  { %v260_v8 = vadd.f32 %v611_v63, %v259_v7 }
 0x1b5   :  { %v463_v9 = vpop.eup %462  ;;  %v445_v10 = vmul.f32 -1.442695, %v260_v8 }
 0x1b6   :  { %v290_v11 = vadd.f32 1.0, %v463_v9 }
 0x1b7   :  { %464 = vpow2.f32 %v445_v10 }
 0x1b8   :  { %466 = vrcp.f32 %v290_v11  ;;  %v307_v24 = vand.u32 2147483648, %v290_v11  ;;  %v305_v27 = vand.u32 2147483647, %v290_v11  ;;  %vm301_vm2 = vweird.f32 %v290_v11 }
 0x1ba   :  { %v262_v15 = vpop.f32.mrf.mxu3  ;;  %v308_v33 = vor.u32 1.1754944e-38, %v307_v24  ;;  %vm306_vm4 = vcmp.eq.f32.partialorder %v305_v27, 8.507059e+37 }
 0x1bb   :  { %v263_v16 = vadd.f32 %v611_v63, %v262_v15 }
 0x1bd   :  { %v465_v17 = vpop.eup %464  ;;  %v446_v18 = vmul.f32 -1.442695, %v263_v16 }
 0x1be   :  { %v467_v19 = vpop.eup %466  ;;  %v291_v20 = vadd.f32 1.0, %v465_v17 }
 0x1bf   :  { %v297_v21 = vmul.f32 %v467_v19, %v290_v11  ;;  %468 = vpow2.f32 %v446_v18  ;;  %vm302_vm1 = vweird.f32 %v467_v19 }
 0x1c0   :  { %470 = vrcp.f32 %v291_v20  ;;  %vm303_vm3 = vmor %vm301_vm2, %vm302_vm1  ;;  %v322_v42 = vand.u32 2147483648, %v291_v20  ;;  %v320_v45 = vand.u32 2147483647, %v291_v20  ;;  %vm316_vm6 = vweird.f32 %v291_v20 }
 0x1c1   :  { %v298_v23 = vsub.f32 1.0, %v297_v21 }
 0x1c2   :  { %v264_v25 = vpop.f32.mrf.mxu3  ;;  %v323_v51 = vor.u32 1.1754944e-38, %v322_v42  ;;  %vm321_vm8 = vcmp.eq.f32.partialorder %v320_v45, 8.507059e+37 }
 0x1c3   :  { %v299_v26 = vmul.f32 %v467_v19, %v298_v23  ;;  %v265_v28 = vadd.f32 %v611_v63, %v264_v25 }
 0x1c5   :  { %v469_v29 = vpop.eup %468  ;;  %v300_v30 = vadd.f32 %v467_v19, %v299_v26  ;;  %v447_v31 = vmul.f32 -1.442695, %v265_v28 }
 0x1c6   :  { %v471_v32 = vpop.eup %470  ;;  %v292_v34 = vadd.f32 1.0, %v469_v29 }
 0x1c7   :  { %v304_v35 = vsel %vm303_vm3, %v467_v19, %v300_v30  ;;  %v312_v36 = vmul.f32 %v471_v32, %v291_v20  ;;  %472 = vpow2.f32 %v447_v31  ;;  %vm317_vm5 = vweird.f32 %v471_v32 }
 0x1c8   :  { %v309_v38 = vsel %vm306_vm4, %v308_v33, %v304_v35  ;;  %474 = vrcp.f32 %v292_v34  ;;  %vm318_vm7 = vmor %vm316_vm6, %vm317_vm5  ;;  %v337_v57 = vand.u32 2147483648, %v292_v34  ;;  %v335_v60 = vand.u32 2147483647, %v292_v34 }
 0x1c9   :  { %386 = vst [vmem:[%s665_s10] sm:$0xff] %v309_v38  ;;  %v313_v39 = vsub.f32 1.0, %v312_v36  ;;  %vm331_vm10 = vweird.f32 %v292_v34 }
 0x1ca   :  { %v267_v43 = vpop.f32.mrf.mxu3  ;;  %v338_v3 = vor.u32 1.1754944e-38, %v337_v57  ;;  %vm336_vm12 = vcmp.eq.f32.partialorder %v335_v60, 8.507059e+37 }
 0x1cb   :  { %v314_v44 = vmul.f32 %v471_v32, %v313_v39  ;;  %v268_v46 = vadd.f32 %v611_v63, %v267_v43 }
 0x1cd   :  { %v473_v47 = vpop.eup %472  ;;  %v315_v48 = vadd.f32 %v471_v32, %v314_v44  ;;  %v448_v49 = vmul.f32 -1.442695, %v268_v46 }
 0x1ce   :  { %v475_v50 = vpop.eup %474  ;;  %v293_v52 = vadd.f32 1.0, %v473_v47 }
 0x1cf   :  { %v319_v53 = vsel %vm318_vm7, %v471_v32, %v315_v48  ;;  %v327_v54 = vmul.f32 %v475_v50, %v292_v34  ;;  %476 = vpow2.f32 %v448_v49  ;;  %vm332_vm9 = vweird.f32 %v475_v50 }
 0x1d0   :  { %v324_v55 = vsel %vm321_vm8, %v323_v51, %v319_v53  ;;  %478 = vrcp.f32 %v293_v52  ;;  %vm333_vm11 = vmor %vm331_vm10, %vm332_vm9  ;;  %v350_v10 = vand.u32 2147483647, %v293_v52  ;;  %vm346_vm14 = vweird.f32 %v293_v52 }
 0x1d1   :  { %387 = vst [vmem:[%s665_s10 + $0x8] sm:$0xff] %v324_v55  ;;  %v328_v56 = vsub.f32 1.0, %v327_v54 }
 0x1d2   :  { %v269_v58 = vpop.f32.mrf.mxu3  ;;  %vm351_vm0 = vcmp.eq.f32.partialorder %v350_v10, 8.507059e+37 }
 0x1d3   :  { %v329_v59 = vmul.f32 %v475_v50, %v328_v56  ;;  %v270_v61 = vadd.f32 %v611_v63, %v269_v58  ;;  %v352_v63 = vand.u32 2147483648, %v293_v52 }
 0x1d5   :  { %v477_v62 = vpop.eup %476  ;;  %v330_v0 = vadd.f32 %v475_v50, %v329_v59  ;;  %v449_v1 = vmul.f32 -1.442695, %v270_v61  ;;  %v353_v14 = vor.u32 1.1754944e-38, %v352_v63 }
 0x1d6   :  { %v479_v2 = vpop.eup %478  ;;  %v294_v4 = vadd.f32 1.0, %v477_v62 }
 0x1d7   :  { %v334_v5 = vsel %vm333_vm11, %v475_v50, %v330_v0  ;;  %v342_v6 = vmul.f32 %v479_v2, %v293_v52  ;;  %480 = vpow2.f32 %v449_v1  ;;  %vm347_vm13 = vweird.f32 %v479_v2 }
 0x1d8   :  { %v339_v7 = vsel %vm336_vm12, %v338_v3, %v334_v5  ;;  %482 = vrcp.f32 %v294_v4  ;;  %vm348_vm15 = vmor %vm346_vm14, %vm347_vm13  ;;  %v367_v20 = vand.u32 2147483648, %v294_v4  ;;  %v365_v22 = vand.u32 2147483647, %v294_v4 }
 0x1d9   :  { %388 = vst [vmem:[%s665_s10 + $0x10] sm:$0xff] %v339_v7  ;;  %v343_v8 = vsub.f32 1.0, %v342_v6  ;;  %vm361_vm2 = vweird.f32 %v294_v4 }
 0x1da   :  { %v368_v25 = vor.u32 1.1754944e-38, %v367_v20  ;;  %vm366_vm4 = vcmp.eq.f32.partialorder %v365_v22, 8.507059e+37 }
 0x1db   :  { %v344_v9 = vmul.f32 %v479_v2, %v343_v8 }
 0x1dd   :  { %v481_v11 = vpop.eup %480  ;;  %v345_v12 = vadd.f32 %v479_v2, %v344_v9 }
 0x1de   :  { %v483_v13 = vpop.eup %482  ;;  %v295_v15 = vadd.f32 1.0, %v481_v11 }
 0x1df   :  { %v349_v16 = vsel %vm348_vm15, %v479_v2, %v345_v12  ;;  %v357_v17 = vmul.f32 %v483_v13, %v294_v4  ;;  %vm362_vm1 = vweird.f32 %v483_v13 }
 0x1e0   :  { %v354_v18 = vsel %vm351_vm0, %v353_v14, %v349_v16  ;;  %484 = vrcp.f32 %v295_v15  ;;  %vm363_vm3 = vmor %vm361_vm2, %vm362_vm1  ;;  %v382_v30 = vand.u32 2147483648, %v295_v15  ;;  %v380_v32 = vand.u32 2147483647, %v295_v15 }
 0x1e1   :  { %389 = vst [vmem:[%s665_s10 + $0x18] sm:$0xff] %v354_v18  ;;  %v358_v19 = vsub.f32 1.0, %v357_v17  ;;  %vm376_vm6 = vweird.f32 %v295_v15 }
 0x1e2   :  { %v383_v34 = vor.u32 1.1754944e-38, %v382_v30  ;;  %vm381_vm8 = vcmp.eq.f32.partialorder %v380_v32, 8.507059e+37 }
 0x1e3   :  { %v359_v21 = vmul.f32 %v483_v13, %v358_v19 }
 0x1e5   :  { %v360_v23 = vadd.f32 %v483_v13, %v359_v21 }
 0x1e6   :  { %v485_v24 = vpop.eup %484 }
 0x1e7   :  { %v364_v26 = vsel %vm363_vm3, %v483_v13, %v360_v23  ;;  %v372_v27 = vmul.f32 %v485_v24, %v295_v15  ;;  %vm377_vm5 = vweird.f32 %v485_v24 }
 0x1e8   :  { %v369_v28 = vsel %vm366_vm4, %v368_v25, %v364_v26  ;;  %vm378_vm7 = vmor %vm376_vm6, %vm377_vm5 }
 0x1e9   :  { %390 = vst [vmem:[%s665_s10 + $0x20] sm:$0xff] %v369_v28  ;;  %v373_v29 = vsub.f32 1.0, %v372_v27 }
 0x1eb   :  { %v374_v31 = vmul.f32 %v485_v24, %v373_v29 }
 0x1ed   :  { %v375_v33 = vadd.f32 %v485_v24, %v374_v31 }
 0x1ef   :  { %v379_v35 = vsel %vm378_vm7, %v485_v24, %v375_v33 }
 0x1f0   :  { %v384_v36 = vsel %vm381_vm8, %v383_v34, %v379_v35 }
 0x1f1   :  { %391 = vst [vmem:[%s665_s10 + $0x28] sm:$0xff] %v384_v36 }

</bundles_post_ra>
